<compile_context>
chip_gen: v7x
topology: tpu7x:2x2x1
jax: 0.10.0
libtpu: 0.0.40
codegen_flags: <defaults>
</compile_context>

<pallas_src>
import jax
import jax.numpy as jnp
from jax.experimental import pallas as pl
from jax.experimental.pallas import tpu as pltpu


def _rowwise_linear_kernel(x_ref, w_ref, b_ref, o_ref):
    # x: (TM, F) VMEM (caller dtype), w: (1, F) f32 VMEM (grid-resident),
    # b: (1,) f32 SMEM scalar, o: (TM, 1) f32 VMEM.
    x = x_ref[...].astype(jnp.float32)
    w = w_ref[...]                       # (1, F) broadcasts over the TM rows.
    o_ref[...] = jnp.sum(x * w, axis=-1, keepdims=True) + b_ref[0]


# Per pipelined input buffer (x2 for double-buffering).  Keeps the kernel far
# below the 32 MiB scoped VMEM default on v7x while still amortizing the
# ~0.35 us per-grid-step overhead (for F=32 f32 this gives TM = 32768 rows).
_TILE_BYTE_BUDGET = 4 * 1024 * 1024


def _pick_tile_rows(n_rows, n_feat, itemsize):
    rows = _TILE_BYTE_BUDGET // max(1, n_feat * itemsize)
    rows = max(512, (rows // 512) * 512)   # sublane-friendly for any dtype
    if n_rows <= rows:
        return n_rows                      # full-extent block: always layout-legal
    return rows


def _linear_rows_pallas(x, w_row, bias):
    """out[i] = dot(x[i, :], w_row[0, :]) + bias, computed on the VPU."""
    B, F = x.shape
    tm = _pick_tile_rows(B, F, x.dtype.itemsize)
    grid = (pl.cdiv(B, tm),)
    return pl.pallas_call(
        _rowwise_linear_kernel,
        out_shape=jax.ShapeDtypeStruct((B, 1), jnp.float32),
        grid_spec=pltpu.PrefetchScalarGridSpec(
            num_scalar_prefetch=0,
            grid=grid,
            in_specs=[
                # Batch-tiled activations, auto-pipelined HBM<->VMEM.
                pl.BlockSpec((tm, F), lambda i: (i, 0)),
                # Weight row: same block every step -> stays resident in VMEM.
                pl.BlockSpec((1, F), lambda i: (0, 0)),
                # Bias: single scalar, lives in SMEM (no per-step vector DMA).
                pl.BlockSpec(memory_space=pltpu.MemorySpace.SMEM),
            ],
            out_specs=pl.BlockSpec((tm, 1), lambda i: (i, 0)),
        ),
        compiler_params=pltpu.CompilerParams(
            # Batch tiles are independent -> megacore-shardable (v7x: 2 TCs).
            dimension_semantics=("parallel",),
        ),
    )(x, w_row, bias)


def cnn_baseline_forward(user_input, item_input, fc_weight, fc_bias,
                         *, min_pallas_rows=0):
    """Pallas equivalent of CNNBaseline.forward.

    user_input: (Bu, F), item_input: (Bi, F) with F = user_dim + item_dim.
    fc_weight:  (1, F)  (PyTorch nn.Linear layout), fc_bias: (1,).
    Returns (Bu + Bi, 1) float32.
    """
    w_row = fc_weight.astype(jnp.float32).reshape(1, -1)  # stays (1, F)
    bias = fc_bias.astype(jnp.float32).reshape(1)

    def one(x):
        if x.shape[0] < min_pallas_rows:
            # Tiny batches: a fused XLA dot+add beats pallas_call overhead.
            return x.astype(jnp.float32) @ w_row.T + bias
        return _linear_rows_pallas(x, w_row, bias)

    # No HBM concat of the full (B, F) activations; only the tiny (B, 1)
    # outputs are concatenated, preserving torch.cat([user, item], 0) order.
    return jnp.concatenate([one(user_input), one(item_input)], axis=0)


def init_params(key, user_dim, item_dim):
    """Deterministic init mirroring nn.Linear(user_dim + item_dim, 1)."""
    in_features = user_dim + item_dim
    kw, kb = jax.random.split(key)
    bound = 1.0 / jnp.sqrt(jnp.float32(in_features))
    fc_weight = jax.random.uniform(
        kw, (1, in_features), jnp.float32, minval=-bound, maxval=bound
    )
    fc_bias = jax.random.uniform(
        kb, (1,), jnp.float32, minval=-bound, maxval=bound
    )
    # TODO(synk): the Conv1d stacks in __init__ are never used in forward(),
    # so their parameters are intentionally not materialized here.
    return fc_weight, fc_bias


if __name__ == "__main__":
    key = jax.random.PRNGKey(0)
    k_params, k_user, k_item = jax.random.split(key, 3)

    # Small shapes consistent with the module: fc in_features = user_dim + item_dim.
    user_dim, item_dim = 16, 16
    feat = user_dim + item_dim            # 32
    batch_user, batch_item = 2, 2

    fc_weight, fc_bias = init_params(k_params, user_dim, item_dim)
    user_input = jax.random.normal(k_user, (batch_user, feat), jnp.float32)
    item_input = jax.random.normal(k_item, (batch_item, feat), jnp.float32)

    out = cnn_baseline_forward(user_input, item_input, fc_weight, fc_bias)
    out = jax.block_until_ready(out)

    # Reference check in plain JAX.
    x_ref = jnp.concatenate([user_input, item_input], axis=0)
    ref = x_ref @ fc_weight.T + fc_bias
    assert out.shape == (batch_user + batch_item, 1)
    assert jnp.allclose(out, ref, atol=1e-5), "mismatch vs reference"

    print("KERNEL_OK")
</pallas_src>

<mosaic_0001>
module attributes {stable_mosaic.version = 11 : i64} {
  func.func @_rowwise_linear_kernel(%arg0: i32, %arg1: memref<2x32xf32, #tpu.memory_space<vmem>>, %arg2: memref<1x32xf32, #tpu.memory_space<vmem>>, %arg3: memref<1xf32, #tpu.memory_space<smem>>, %arg4: memref<2x1xf32, #tpu.memory_space<vmem>>) attributes {dimension_semantics = [#tpu.dimension_semantics<parallel>], iteration_bounds = array<i64: 1>, scalar_prefetch = 0 : i64, scratch_operands = 0 : i64, tpu.core_type = #tpu.core_type<tc>, window_params = [{transform_indices = @transform_0, window_bounds = array<i64: 2, 32>}, {pipeline_mode = #tpu.pipeline_mode<synchronous>, transform_indices = @transform_1, window_bounds = array<i64: 1, 32>}, {transform_indices = @transform_2, window_bounds = array<i64: 1>}, {transform_indices = @transform_3, window_bounds = array<i64: 2, 1>}]} {
    %c0 = arith.constant 0 : index
    %c0_0 = arith.constant 0 : index
    %0 = vector.load %arg1[%c0, %c0_0] : memref<2x32xf32, #tpu.memory_space<vmem>>, vector<2x32xf32>
    %c0_1 = arith.constant 0 : index
    %c0_2 = arith.constant 0 : index
    %1 = vector.load %arg2[%c0_1, %c0_2] : memref<1x32xf32, #tpu.memory_space<vmem>>, vector<1x32xf32>
    %2 = vector.broadcast %1 : vector<1x32xf32> to vector<2x32xf32>
    %3 = arith.mulf %0, %2 : vector<2x32xf32>
    %cst = arith.constant dense<0.000000e+00> : vector<2xf32>
    %4 = vector.multi_reduction <add>, %3, %cst [1] : vector<2x32xf32> to vector<2xf32>
    %5 = vector.shape_cast %4 : vector<2xf32> to vector<2x1xf32>
    %c0_3 = arith.constant 0 : index
    %6 = memref.load %arg3[%c0_3] : memref<1xf32, #tpu.memory_space<smem>>
    %7 = vector.broadcast %6 : f32 to vector<2x1xf32>
    %8 = arith.addf %5, %7 : vector<2x1xf32>
    %c0_4 = arith.constant 0 : index
    %c0_5 = arith.constant 0 : index
    %9 = vector.load %arg4[%c0_4, %c0_5] : memref<2x1xf32, #tpu.memory_space<vmem>>, vector<2x1xf32>
    tpu.vector_store %arg4[%c0_4, %c0_5], %8 {strides = array<i32>} : memref<2x1xf32, #tpu.memory_space<vmem>>, vector<2x1xf32>,
    return
  }
  func.func @transform_0(%arg0: i32) -> (i32, i32) {
    %c0_i32 = arith.constant 0 : i32
    %c0_i32_0 = arith.constant 0 : i32
    return %arg0, %c0_i32 : i32, i32
  }
  func.func @transform_1(%arg0: i32) -> (i32, i32) {
    %c0_i32 = arith.constant 0 : i32
    %c0_i32_0 = arith.constant 0 : i32
    %c0_i32_1 = arith.constant 0 : i32
    return %c0_i32, %c0_i32_0 : i32, i32
  }
  func.func @transform_2(%arg0: i32) -> i32 {
    %c0_i32 = arith.constant 0 : i32
    %c0_i32_0 = arith.constant 0 : i32
    return %c0_i32 : i32
  }
  func.func @transform_3(%arg0: i32) -> (i32, i32) {
    %c0_i32 = arith.constant 0 : i32
    %c0_i32_0 = arith.constant 0 : i32
    return %arg0, %c0_i32 : i32, i32
  }
}

</mosaic_0001>

<bundles_post_ra>
// kernel: tpu_custom_call.1
= control target key start
LH: loop header
LB: loop body
LE: loop exit
PB: predicated region body
PF: predicated region fallthrough
CT: control target
= control target key end

     0   :  { %vm24_vm0 = vcmask 254976   ;;  %vm31_vm1 = vcmask 1024   ;;  %s70_s0 = inlined_call_operand.vmem [shape: f32[2,32], index: 0, kind: input, shape index: {}]   ;;  %s71_s1 = inlined_call_operand.vmem [shape: f32[1,32], index: 1, kind: input, shape index: {}]   ;;  %s72_s2 = inlined_call_operand.<no memory space> [shape: f32[1], index: 2, kind: input, shape index: {}]   ;;  %s73_s3 = inlined_call_operand.vmem [shape: f32[2,1], index: 3, kind: output, shape index: {}]  }
   0x1   :  { %v15_v0 = vld [vmem:[%s70_s0] sm:$0x3]  ;;  %v29_v4 = vstv %s72_s2 }
   0x2   :  { %v37_v1 = vld [vmem:[%s71_s1] ss:$0 sm:$0xff] }
   0x3   :  { %v23_v2 = vmul.f32 %v37_v1, %v15_v0 }
   0x5   :  { %v25_v3 = vsel %vm24_vm0, %v23_v2, 0.0 }
   0x6   :  { %26 = vadd.xlane.f32.xlu0 %v25_v3 }
  0x93   :  { %v27_v5 = vpop.xlane.xlu0 %26 }
  0x94   :  { %v30_v6 = vadd.f32 %v29_v4, %v27_v5 }
  0x96   :  { %32 = vst.msk [vmem:[%s73_s3] sm:$0x3] %vm31_vm1, %v30_v6 }

</bundles_post_ra>
